<compile_context>
chip_gen: v7x
topology: tpu7x:2x2x1
jax: 0.10.0
libtpu: 0.0.40
codegen_flags: <defaults>
</compile_context>

<pallas_src>
import functools

import jax
import jax.numpy as jnp
from jax import lax
from jax.experimental import pallas as pl
from jax.experimental.pallas import tpu as pltpu


_CHUNK = 512               # points per in-kernel step (lane axis)
_TILE_ROWS_CAP = 32768     # points per grid step (64 chunks => O(MB) HBM / step)
_STATIC_UNROLL_CHUNKS = 8  # below this, unroll the chunk loop with static offsets


def _round_up(x, m):
    return ((x + m - 1) // m) * m


def _tensorcores_per_chip():
    """Best-effort TensorCores per chip (v7x: 2; v5e/v6e: 1).

    Only used to decide whether a medium-sized problem should be split into
    >=2 grid steps so dimension_semantics=("parallel",) has work for both
    cores.  On any failure we assume 1 (never split), which is the right
    default for single-TC v5e/v6e.
    """
    try:
        info = pltpu.get_tpu_info()
        for attr in ("num_tensorcores", "tensorcores_per_chip", "num_cores"):
            v = getattr(info, attr, None)
            if isinstance(v, int) and 1 <= v <= 8:
                return v
        if "7" in str(getattr(info, "chip_version", "")):
            return 2
    except Exception:
        pass
    return 1


def _choose_chunks_per_tile(n_chunks, cap_chunks, n_cores):
    """Chunks (512-point groups) per grid step."""
    cap = max(16, (cap_chunks // 16) * 16)  # 16: sublane multiple for f32 & bf16
    if n_chunks > cap:
        return cap                          # large M: many grid steps anyway
    if n_cores > 1 and n_chunks >= 16 * n_cores:
        per = _round_up(pl.cdiv(n_chunks, n_cores), 16)
        if per < n_chunks:
            return per                      # v7x: >=2 steps so both TCs get work
    return n_chunks                         # single step on single-TC chips


def _vmem_limit_bytes(c_in, c_out, chunks_per_tile, chunk, in_dtype, out_dtype,
                      layer_params):
    """Right-size the scoped-VMEM request from the actual buffer footprint:
    double-buffered in/out tiles + single-buffered weights + headroom for
    compiler temporaries; clamped to <=32 MiB so the same number is safe on
    64 MiB-per-TC v7x as well as 128 MiB v5e/v6e."""
    sub = _round_up(chunks_per_tile, 8)
    in_bytes = 2 * c_in * sub * chunk * jnp.dtype(in_dtype).itemsize
    out_bytes = 2 * c_out * sub * chunk * jnp.dtype(out_dtype).itemsize
    w_bytes = 0
    for w, _ in layer_params:
        fo, fi = w.shape
        w_bytes += (_round_up(fo, 8) * _round_up(fi, 128)
                    + _round_up(fo, 8) * 128) * 4
    total = in_bytes + out_bytes + w_bytes
    return int(min(32 << 20, max(2 * total + (8 << 20), 16 << 20)))


def _linear_swish_kernel(x_ref, *rest, num_layers):
    """One row-tile of (Linear -> Swish) x num_layers, channels-first.

    x_ref: (c_in, n_tile, chunk)   o_ref: (c_out, n_tile, chunk)
    rest[:-1] = (w0, b0, w1, b1, ...); w_l: (fan_out, fan_in), b_l: (fan_out, 1).
    The 512-point chunk loop keeps per-layer activations register resident; all
    loads/stores use the full 128-lane width.
    """
    o_ref = rest[-1]
    wb = rest[:-1]
    n_tile = x_ref.shape[1]

    # Hoist the tiny, grid-invariant weights/biases out of the chunk loop.
    ws = [wb[2 * l][...].astype(jnp.float32) for l in range(num_layers)]
    bs = [wb[2 * l + 1][...].astype(jnp.float32) for l in range(num_layers)]

    def process_chunk(j):
        h = x_ref[:, j, :].astype(jnp.float32)                  # (c_in, chunk)
        for w, b in zip(ws, bs):
            h = jnp.dot(w, h, preferred_element_type=jnp.float32) + b
            h = h * (1.0 / (1.0 + jnp.exp(-h)))                  # exact Swish
        o_ref[:, j, :] = h.astype(o_ref.dtype)

    if n_tile <= _STATIC_UNROLL_CHUNKS:
        for j in range(n_tile):                                  # static offsets
            process_chunk(j)
    else:
        def body(j, carry):
            process_chunk(j)
            return carry
        lax.fori_loop(0, n_tile, body, 0)


def _linear_swish_stack_cf(x3, layer_params, *, chunks_per_tile, out_dtype):
    """pallas_call over the channels-first chunked view x3: (c_in, n, chunk)."""
    c_in, n, chunk = x3.shape
    num_layers = len(layer_params)

    invariant = lambda i: (0, 0)
    weight_args, weight_specs = [], []
    fan_in = c_in
    flops = transcendentals = weight_bytes = 0
    rows = n * chunk
    for (w, b) in layer_params:
        fan_out, w_in = w.shape
        assert w_in == fan_in, "layer dims must chain"
        weight_args += [w.astype(jnp.float32),
                        b.astype(jnp.float32).reshape(fan_out, 1)]
        # Grid-invariant weights/biases: single VMEM buffer, DMA'd once.
        weight_specs += [
            pl.BlockSpec((fan_out, fan_in), invariant,
                         pipeline_mode=pl.Buffered(1)),
            pl.BlockSpec((fan_out, 1), invariant,
                         pipeline_mode=pl.Buffered(1)),
        ]
        flops += 2 * rows * fan_in * fan_out + 4 * rows * fan_out
        transcendentals += rows * fan_out
        weight_bytes += (fan_out * fan_in + fan_out) * 4
        fan_in = fan_out
    c_out = fan_in

    bytes_accessed = rows * (c_in * jnp.dtype(x3.dtype).itemsize
                             + c_out * jnp.dtype(out_dtype).itemsize) + weight_bytes

    kernel = functools.partial(_linear_swish_kernel, num_layers=num_layers)

    return pl.pallas_call(
        kernel,
        out_shape=jax.ShapeDtypeStruct((c_out, n, chunk), out_dtype),
        grid_spec=pltpu.PrefetchScalarGridSpec(
            num_scalar_prefetch=0,
            grid=(pl.cdiv(n, chunks_per_tile),),
            in_specs=[pl.BlockSpec((c_in, chunks_per_tile, chunk),
                                   lambda i: (0, i, 0))] + weight_specs,
            out_specs=pl.BlockSpec((c_out, chunks_per_tile, chunk),
                                   lambda i: (0, i, 0)),
        ),
        compiler_params=pltpu.CompilerParams(
            dimension_semantics=("parallel",),
            vmem_limit_bytes=_vmem_limit_bytes(c_in, c_out, chunks_per_tile,
                                               chunk, x3.dtype, out_dtype,
                                               layer_params),
        ),
        cost_estimate=pl.CostEstimate(
            flops=int(flops),
            transcendentals=int(transcendentals),
            bytes_accessed=int(bytes_accessed),
        ),
    )(x3, *weight_args)


def linear_block_stack_values(values_2d, layer_params, *,
                              chunk=_CHUNK,
                              tile_rows=_TILE_ROWS_CAP,
                              xla_fallback_rows=0):
    """Apply a stack of LinearBlocks (Linear -> Swish) to (M, c_in) values.

    layer_params: tuple of (w, b) in the native nn.Linear layout,
    w: (fan_out, fan_in), b: (fan_out,).  Output: (M, c_out), same dtype as
    `values_2d` (bf16 in -> bf16 out; math is f32 inside the kernel).
    """
    M, c_in = values_2d.shape
    assert len(layer_params) >= 1
    c_out = layer_params[-1][0].shape[0]

    if M <= xla_fallback_rows:
        # Small-M bypass (review): for tiny inputs the pallas_call launch and
        # pipeline ramp dominate, so let XLA's fused path handle it.  Disabled
        # by default (0) so the demo below exercises the Pallas kernel; set to
        # a few thousand rows in production.
        h = values_2d.astype(jnp.float32)
        for w, b in layer_params:
            h = jnp.dot(h, w.T.astype(jnp.float32),
                        precision=lax.Precision.HIGHEST) + b.astype(jnp.float32)
            h = h * jax.nn.sigmoid(h)
        return h.astype(values_2d.dtype)

    # Channels-first, lane-dense view (review item #1):
    # (M, c_in) -> (c_in, M) -> (c_in, n_chunks, chunk).  This transpose/pad is
    # boundary plumbing; callers that keep values channels-first end-to-end
    # should call _linear_swish_stack_cf directly and skip it.
    chunk = max(128, min(chunk, _round_up(M, 128)))
    n = pl.cdiv(M, chunk)
    m_pad = n * chunk
    x_cf = values_2d.T
    if m_pad != M:
        x_cf = jnp.pad(x_cf, ((0, 0), (0, m_pad - M)))  # pads the small input side
    x3 = x_cf.reshape(c_in, n, chunk)

    chunks_per_tile = _choose_chunks_per_tile(
        n, max(1, tile_rows // chunk), _tensorcores_per_chip())

    out3 = _linear_swish_stack_cf(x3, layer_params,
                                  chunks_per_tile=chunks_per_tile,
                                  out_dtype=values_2d.dtype)
    # Bit-identical un-chunk, then drop the pad and return to the module's
    # channels-last layout (the slice folds into the single transpose copy).
    return out3.reshape(c_out, m_pad)[:, :M].T


def _apply_on_tuple(x_tuple, layer_params):
    """Mirrors LinearBlock.forward's reshape(-1, C) / reshape-back on values."""
    coords, values, mask = x_tuple
    lead = values.shape[:-1]
    flat = values.reshape(-1, values.shape[-1])
    out_flat = linear_block_stack_values(flat, layer_params)
    return coords, out_flat.reshape(*lead, out_flat.shape[-1]), mask


def linear_block_forward(x_tuple, params):
    """Single LinearBlock (the spec module): Linear -> Swish on values."""
    # TODO(synk): MaskBatchNormNd (use_bn=True branch) not implemented; the
    # module default use_bn=False never exercises it.
    return _apply_on_tuple(x_tuple, (params,))


def weightnet_forward(x_tuple, layer_params):
    """WeightNet = 3 stacked LinearBlocks, fused into one Pallas kernel."""
    return _apply_on_tuple(x_tuple, layer_params)


def init_linear_params(key, dims, dtype=jnp.float32):
    """nn.Linear default init, weights in torch's native (out, in) layout."""
    params = []
    for i, (fan_in, fan_out) in enumerate(dims):
        kw, kb = jax.random.split(jax.random.fold_in(key, i))
        bound = 1.0 / float(fan_in) ** 0.5
        w = jax.random.uniform(kw, (fan_out, fan_in), dtype, -bound, bound)
        b = jax.random.uniform(kb, (fan_out,), dtype, -bound, bound)
        params.append((w, b))
    return tuple(params)


def reference_forward(x_tuple, layer_params):
    """Pure-JAX/XLA reference (exact sigmoid, highest-precision matmul)."""
    coords, values, mask = x_tuple
    h = values.astype(jnp.float32)
    for w, b in layer_params:
        h = jnp.dot(h, w.T.astype(jnp.float32),
                    precision=lax.Precision.HIGHEST) + b.astype(jnp.float32)
        h = h * jax.nn.sigmoid(h)
    return coords, h, mask


if __name__ == "__main__":
    key = jax.random.PRNGKey(0)
    k_c, k_v, k_p1, k_p3, k_vbig = jax.random.split(key, 5)

    # Point-cloud style inputs: 3-D relative offsets as input features.
    batch, num_points = 2, 64
    in_features, hidden_features, out_features = 3, 32, 16

    coords = jax.random.normal(k_c, (batch, num_points, 3), jnp.float32)
    values = jax.random.normal(k_v, (batch, num_points, in_features), jnp.float32)
    mask = jnp.ones((batch, num_points), dtype=bool)
    x = (coords, values, mask)

    # Exact sigmoid in-kernel -> tight tolerance (was 5e-3 with approx recip).
    TOL = dict(atol=5e-4, rtol=5e-4)

    # 1) Single LinearBlock (the spec module): Linear(3 -> 16) + Swish.
    (lb_params,) = init_linear_params(k_p1, [(in_features, out_features)])
    oc, ov, om = jax.block_until_ready(linear_block_forward(x, lb_params))
    _, rv, _ = reference_forward(x, (lb_params,))
    assert ov.shape == (batch, num_points, out_features)
    assert bool(jnp.allclose(ov, rv, **TOL))
    assert bool(jnp.array_equal(oc, coords)) and bool(jnp.array_equal(om, mask))

    # 2) WeightNet = 3 stacked LinearBlocks (3 -> 32 -> 32 -> 16), one kernel.
    wn_params = init_linear_params(
        k_p3, [(in_features, hidden_features),
               (hidden_features, hidden_features),
               (hidden_features, out_features)])
    oc3, ov3, om3 = jax.block_until_ready(weightnet_forward(x, wn_params))
    _, rv3, _ = reference_forward(x, wn_params)
    assert ov3.shape == (batch, num_points, out_features)
    assert bool(jnp.allclose(ov3, rv3, **TOL))
    assert bool(jnp.array_equal(oc3, coords)) and bool(jnp.array_equal(om3, mask))

    # 3) Larger point count: exercises the chunked loop, the pad-to-chunk
    #    boundary and a multi-step (ragged last block) grid.
    big_b, big_n = 4, 10000                       # M = 40000 points
    vals_big = jax.random.normal(k_vbig, (big_b, big_n, in_features), jnp.float32)
    coords_big = jnp.zeros((big_b, big_n, 3), jnp.float32)
    mask_big = jnp.ones((big_b, big_n), dtype=bool)
    x_big = (coords_big, vals_big, mask_big)
    _, ovb, _ = jax.block_until_ready(weightnet_forward(x_big, wn_params))
    _, rvb, _ = reference_forward(x_big, wn_params)
    assert ovb.shape == (big_b, big_n, out_features)
    assert bool(jnp.allclose(ovb, rvb, **TOL))

    # 4) bf16 values I/O (review: halves HBM traffic on v6e/v7x); math stays
    #    f32 inside the kernel, so only the output rounding differs.
    vals_bf16 = vals_big.astype(jnp.bfloat16)
    _, ovh, _ = jax.block_until_ready(
        weightnet_forward((coords_big, vals_bf16, mask_big), wn_params))
    assert ovh.dtype == jnp.bfloat16
    _, rvh, _ = reference_forward(
        (coords_big, vals_bf16.astype(jnp.float32), mask_big), wn_params)
    assert bool(jnp.allclose(ovh.astype(jnp.float32), rvh, atol=3e-2, rtol=3e-2))

    print("KERNEL_OK")
</pallas_src>

<mosaic_0001>
module attributes {stable_mosaic.version = 11 : i64} {
  func.func @_linear_swish_kernel(%arg0: i32, %arg1: memref<3x1x128xf32, #tpu.memory_space<vmem>>, %arg2: memref<16x3xf32, #tpu.memory_space<vmem>>, %arg3: memref<16x1xf32, #tpu.memory_space<vmem>>, %arg4: memref<16x1x128xf32, #tpu.memory_space<vmem>>) attributes {dimension_semantics = [#tpu.dimension_semantics<parallel>], iteration_bounds = array<i64: 1>, scalar_prefetch = 0 : i64, scratch_operands = 0 : i64, tpu.core_type = #tpu.core_type<tc>, window_params = [{transform_indices = @transform_0, window_bounds = array<i64: 3, 1, 128>}, {pipeline_mode = #tpu.pipeline_mode<synchronous>, transform_indices = @transform_1, window_bounds = array<i64: 16, 3>}, {pipeline_mode = #tpu.pipeline_mode<synchronous>, transform_indices = @transform_2, window_bounds = array<i64: 16, 1>}, {transform_indices = @transform_3, window_bounds = array<i64: 16, 1, 128>}]} {
    %c0 = arith.constant 0 : index
    %c0_0 = arith.constant 0 : index
    %0 = vector.load %arg2[%c0, %c0_0] : memref<16x3xf32, #tpu.memory_space<vmem>>, vector<16x3xf32>
    %c0_1 = arith.constant 0 : index
    %c0_2 = arith.constant 0 : index
    %1 = vector.load %arg3[%c0_1, %c0_2] : memref<16x1xf32, #tpu.memory_space<vmem>>, vector<16x1xf32>
    %c0_3 = arith.constant 0 : index
    %c0_4 = arith.constant 0 : index
    %c0_5 = arith.constant 0 : index
    %2 = vector.load %arg1[%c0_3, %c0_4, %c0_5] : memref<3x1x128xf32, #tpu.memory_space<vmem>>, vector<3x1x128xf32>
    %3 = vector.shape_cast %2 : vector<3x1x128xf32> to vector<3x128xf32>
    %cst = arith.constant dense<0.000000e+00> : vector<16x128xf32>
    %4 = tpu.matmul %0, %3, %cst {dimension_numbers = #tpu.dot_dimension_numbers<[1], [0], [0], [1], [0, 0, 1, 1], [], []>} : vector<16x3xf32>, vector<3x128xf32>, vector<16x128xf32> -> vector<16x128xf32>
    %5 = vector.broadcast %1 : vector<16x1xf32> to vector<16x128xf32>
    %6 = arith.addf %4, %5 : vector<16x128xf32>
    %cst_6 = arith.constant 0.000000e+00 : f32
    %7 = vector.broadcast %cst_6 : f32 to vector<16x128xf32>
    %8 = arith.subf %7, %6 : vector<16x128xf32>
    %9 = math.exp %8 : vector<16x128xf32>
    %cst_7 = arith.constant 1.000000e+00 : f32
    %10 = vector.broadcast %cst_7 : f32 to vector<16x128xf32>
    %11 = arith.addf %10, %9 : vector<16x128xf32>
    %cst_8 = arith.constant 1.000000e+00 : f32
    %12 = vector.broadcast %cst_8 : f32 to vector<16x128xf32>
    %13 = arith.divf %12, %11 : vector<16x128xf32>
    %14 = arith.mulf %6, %13 : vector<16x128xf32>
    %c0_9 = arith.constant 0 : index
    %c0_10 = arith.constant 0 : index
    %c0_11 = arith.constant 0 : index
    %15 = vector.load %arg4[%c0_9, %c0_10, %c0_11] : memref<16x1x128xf32, #tpu.memory_space<vmem>>, vector<16x1x128xf32>
    %16 = vector.shape_cast %15 : vector<16x1x128xf32> to vector<16x128xf32>
    %17 = vector.shape_cast %14 : vector<16x128xf32> to vector<16x1x128xf32>
    tpu.vector_store %arg4[%c0_9, %c0_10, %c0_11], %17 {strides = array<i32>} : memref<16x1x128xf32, #tpu.memory_space<vmem>>, vector<16x1x128xf32>,
    return
  }
  func.func @transform_0(%arg0: i32) -> (i32, i32, i32) {
    %c0_i32 = arith.constant 0 : i32
    %c0_i32_0 = arith.constant 0 : i32
    %c0_i32_1 = arith.constant 0 : i32
    return %c0_i32, %arg0, %c0_i32_0 : i32, i32, i32
  }
  func.func @transform_1(%arg0: i32) -> (i32, i32) {
    %c0_i32 = arith.constant 0 : i32
    %c0_i32_0 = arith.constant 0 : i32
    %c0_i32_1 = arith.constant 0 : i32
    return %c0_i32, %c0_i32_0 : i32, i32
  }
  func.func @transform_2(%arg0: i32) -> (i32, i32) {
    %c0_i32 = arith.constant 0 : i32
    %c0_i32_0 = arith.constant 0 : i32
    %c0_i32_1 = arith.constant 0 : i32
    return %c0_i32, %c0_i32_0 : i32, i32
  }
  func.func @transform_3(%arg0: i32) -> (i32, i32, i32) {
    %c0_i32 = arith.constant 0 : i32
    %c0_i32_0 = arith.constant 0 : i32
    %c0_i32_1 = arith.constant 0 : i32
    return %c0_i32, %arg0, %c0_i32_0 : i32, i32, i32
  }
}

</mosaic_0001>

<bundles_post_ra>
// kernel: tpu_custom_call.1
= control target key start
LH: loop header
LB: loop body
LE: loop exit
PB: predicated region body
PF: predicated region fallthrough
CT: control target
= control target key end

     0   :  { %v39_v2 = vlaneseq  ;;  %v363_v3 = vmov 1966171168   ;;  %vm58_vm0 = vcmask 23552   ;;  %v364_v10 = vmov 0   ;;  %s439_s0 = inlined_call_operand.vmem [shape: f32[3,1,128], index: 0, kind: input, shape index: {}]   ;;  %s440_s1 = inlined_call_operand.vmem [shape: f32[16,3], index: 1, kind: input, shape index: {}]   ;;  %s441_s2 = inlined_call_operand.vmem [shape: f32[16,1], index: 2, kind: input, shape index: {}]   ;;  %s442_s3 = inlined_call_operand.hbm [shape: f32[16,1,128], index: 3, kind: output, shape index: {}]  }
   0x1   :  { %v19_v0 = vld [vmem:[%s439_s0] sm:$0x1]  ;;  %v20_v1 = vld [vmem:[%s439_s0 + $0x1] sm:$0x1]  ;;  %v37_v4 = vunpack.c.l.s4 %v363_v3  ;;  %330 = vset.pattern.permute.xlu0 %v364_v10 }
   0x2   :  { %v15_v5 = vld [vmem:[%s440_s1] sm:$0xff]  ;;  %v40_v6 = vshrl.u32 %v39_v2, 7  ;;  %v35_v8 = vcombine.low %v19_v0, %v20_v1 }
   0x3   :  { %v17_v7 = vld [vmem:[%s441_s2] sm:$0xff]  ;;  %v38_v9 = vunpack.c.0.s8 %v37_v4  ;;  %322 = vmatprep.mubr.msk.f32.mxu0 %vm58_vm0, %v15_v5 }
   0x4   :  { %8 = vsyncpa [#allocation3], 0  ;;  %24 = vperm.xlu0 %330, %v17_v7   ;;  %v18_v12 = vld [vmem:[%s441_s2 + $0x8] sm:$0xff]  ;;  %vm65_vm1 = vcmask 1042432  }
   0x5   :  { %v401_v11 = vsub.s32 %v38_v9, %v40_v6  ;;  %v305_v13 = vld.sshfl [vmem:[%s439_s0 + $0x2] sm:$0x1 pattern:$0x75316420]  ;;  %v16_v17 = vld [vmem:[%s440_s1 + $0x8] sm:$0xff]  ;;  %s365_s0 = smov [#allocation2]  }
   0x6   :  { %s294_s1 = sshll.u32 %s365_s0, 4  ;;  %s295_s1 = int_to_ptr.vmem [resolvable:$true] %s294_s1 }
   0x7   :  { %v42_v14 = vrot.slane %v35_v8, %v401_v11  ;;  %s339_s2 = scalar_lea.vmem %s295_s1, 256  ;;  %p344_p1 = scmp.lt.s32.totalorder %s295_s1, %s295_s1 }
   0x8   :  { %29 = vperm.xlu0 %330, %v18_v12   ;;  %p340_p0 = scmp.ne.s32.totalorder %s295_s1, %s339_s2  ;;  %p345_p2 = scmp.lt.s32.totalorder %s339_s2, %s339_s2 }
   0x9   :  { %v50_v15 = vcombine.low %v42_v14, %v305_v13 }
   0xa   :  { %p346_p3 = por %p345_p2, %p344_p1 }
   0xb   :  { %v57_v16 = vrot.slane %v50_v15, %v401_v11 }
   0xc   :  { %p347_p4 = pnand %p346_p3, %p340_p0 }
   0xd   :  { %320 = vmatprep.subr.msk.mxu0 %vm65_vm1, %v57_v16 }
   0xe   :  { %321 = vmatpush3.msk.msra.mxu0 %vm65_vm1, %v57_v16 }
   0xf   :  { %323 = vmatmul.mubr.msk.f32.vlgmr.msra.gmra.mrb[0].mxu0 %vm58_vm0, %v16_v17 }
  0x83   :  { %v25_v18 = vpop.permute.xlu0 %24 }
  0x87   :  { %v30_v19 = vpop.permute.xlu0 %29 }
  0xe2   :  { %v324_v20 = vpop.f32.mrb[0].mxu0 }
  0xe3   :  { %v140_v21 = vadd.f32 %v324_v20, %v30_v19  ;;  %v134_v22 = vpop.f32.mrb[1].mxu0 }
  0xe4   :  { %v135_v23 = vadd.f32 %v134_v22, %v25_v18 }
  0xe5   :  { %v144_v24 = vsub.f32 0.0, %v140_v21 }
  0xe6   :  { %v143_v25 = vsub.f32 0.0, %v135_v23 }
  0xe7   :  { %v147_v26 = vmul.f32 1.442695, %v144_v24 }
  0xe8   :  { %v145_v27 = vmul.f32 1.442695, %v143_v25 }
  0xe9   :  { %331 = vpow2.f32 %v147_v26 }
  0xea   :  { %333 = vpow2.f32 %v145_v27 }
  0xf3   :  { %v332_v28 = vpop.eup %331 }
  0xf4   :  { %v334_v29 = vpop.eup %333  ;;  %v150_v30 = vadd.f32 1.0, %v332_v28 }
  0xf5   :  { %v149_v31 = vadd.f32 1.0, %v334_v29 }
  0xf6   :  { %335 = vrcp.f32 %v150_v30 }
  0xf7   :  { %337 = vrcp.f32 %v149_v31 }
 0x100   :  { %v336_v32 = vpop.eup %335 }
 0x101   :  { %v338_v33 = vpop.eup %337  ;;  %v156_v34 = vmul.f32 %v336_v32, %v140_v21 }
 0x102   :  { %v155_v35 = vmul.f32 %v338_v33, %v135_v23 }
 0x103   :  { %v208_v36 = vcombine.high %v156_v34, %v156_v34  ;;  %v215_v37 = vrot.slane %v156_v34, %v401_v11 }
 0x104   :  { %v159_v38 = vcombine.high %v155_v35, %v155_v35  ;;  %v166_v39 = vrot.slane %v155_v35, %v401_v11 }
 0x105   :  { %v222_v40 = vrot.slane %v208_v36, %v401_v11  ;;  %v223_v41 = vcombine.high %v215_v37, %v215_v37  ;;  %v231_v42 = vrot.slane %v215_v37, %v401_v11  ;;  %313 = vst.sshfl [vmem:[#allocation2 + $0x8] sm:$0x1 pattern:$0x73625140] %v215_v37 }
 0x106   :  { %v173_v43 = vrot.slane %v159_v38, %v401_v11  ;;  %v174_v44 = vcombine.high %v166_v39, %v166_v39  ;;  %v182_v45 = vrot.slane %v166_v39, %v401_v11  ;;  %309 = vst.sshfl [vmem:[#allocation2] sm:$0x1 pattern:$0x73625140] %v166_v39 }
 0x107   :  { %v224_v46 = vcombine.high %v222_v40, %v222_v40  ;;  %v238_v47 = vrot.slane %v222_v40, %v401_v11  ;;  %v245_v48 = vrot.slane %v223_v41, %v401_v11  ;;  %v253_v49 = vcombine.high %v231_v42, %v231_v42  ;;  %314 = vst.sshfl [vmem:[#allocation2 + $0x9] sm:$0x1 pattern:$0x73625140] %v223_v41 }
 0x108   :  { %315 = vst.sshfl [vmem:[#allocation2 + $0xc] sm:$0x1 pattern:$0x73625140] %v222_v40  ;;  %v175_v50 = vcombine.high %v173_v43, %v173_v43  ;;  %v189_v51 = vrot.slane %v173_v43, %v401_v11  ;;  %v196_v52 = vrot.slane %v174_v44, %v401_v11  ;;  %v204_v53 = vcombine.high %v182_v45, %v182_v45 }
 0x109   :  { %310 = vst.sshfl [vmem:[#allocation2 + $0x1] sm:$0x1 pattern:$0x73625140] %v174_v44  ;;  %v252_v54 = vrot.slane %v224_v46, %v401_v11  ;;  %v254_v55 = vcombine.high %v238_v47, %v238_v47  ;;  %v255_v56 = vcombine.high %v245_v48, %v245_v48  ;;  %283 = vst [vmem:[#allocation2 + $0xa] sm:$0x1] %v253_v49 }
 0x10a   :  { %311 = vst.sshfl [vmem:[#allocation2 + $0x4] sm:$0x1 pattern:$0x73625140] %v173_v43  ;;  %v203_v57 = vrot.slane %v175_v50, %v401_v11  ;;  %v205_v58 = vcombine.high %v189_v51, %v189_v51  ;;  %v206_v59 = vcombine.high %v196_v52, %v196_v52  ;;  %275 = vst [vmem:[#allocation2 + $0x2] sm:$0x1] %v204_v53 }
 0x10b   :  { %316 = vst.sshfl [vmem:[#allocation2 + $0xd] sm:$0x1 pattern:$0x73625140] %v224_v46  ;;  %v256_v60 = vcombine.high %v252_v54, %v252_v54  ;;  %284 = vst [vmem:[#allocation2 + $0xb] sm:$0x1] %v255_v56 }
 0x10c   :  { %312 = vst.sshfl [vmem:[#allocation2 + $0x5] sm:$0x1 pattern:$0x73625140] %v175_v50  ;;  %287 = vst [vmem:[#allocation2 + $0xe] sm:$0x1] %v254_v55  ;;  %v207_v61 = vcombine.high %v203_v57, %v203_v57 }
 0x10d   :  { %276 = vst [vmem:[#allocation2 + $0x3] sm:$0x1] %v206_v59  ;;  %279 = vst [vmem:[#allocation2 + $0x6] sm:$0x1] %v205_v58 }
 0x10e   :  { %288 = vst [vmem:[#allocation2 + $0xf] sm:$0x1] %v256_v60  ;;  %280 = vst [vmem:[#allocation2 + $0x7] sm:$0x1] %v207_v61 }
 0x10f   :  { %350 = shalt.err (!%p347_p4)
}
 0x110   :  { %s351_s28 = scalar_lea.hbm %s442_s3, 256 }
 0x111   :  { %p352_p5 = scmp.ne.s32.totalorder %s442_s3, %s351_s28  ;;  %p355_p6 = scmp.lt.u32.totalorder %s351_s28, %s442_s3 }
 0x113   :  { %p357_p7 = pnand %p355_p6, %p352_p5 }
 0x115   :  { %360 = shalt.err (!%p357_p7)
}
 0x116   :  { %s366_s6 = smov 16   ;;  %s367_s7 = smov 1  }
 0x117   :  { %300 = dma.vmem_to_hbm [thread:$0]  %s295_s1, 256, %s442_s3, [#allocation3], %s366_s6, %s366_s6, %s367_s7  }
 0x118   :  { %361 = dma.done.wait [#allocation3], 256  }
 0x119   :  { %362 = vsyncadd [#allocation3], 4294967040 }
 0x11a   :  { %304 = vsyncpa [#allocation3], 1 }

</bundles_post_ra>
